<compile_context>
chip_gen: v6e
topology: v6e:2x2x1
jax: 0.10.0
libtpu: 0.0.40
codegen_flags: <defaults>
</compile_context>

<pallas_src>
import jax
import jax.numpy as jnp
from jax.experimental import pallas as pl
from jax.experimental.pallas import tpu as pltpu

_LANE = 128   # vreg lane width: hidden / action dims padded to this for the MXU


def _round_up(n, m):
    return ((n + m - 1) // m) * m


# ---------------------------------------------------------------------------
# Kernel
# ---------------------------------------------------------------------------
def _dqn_kernel(x_ref, w1_ref, b1_ref, w2_ref, b2_ref, w3_ref, b3_ref, o_ref):
    # x tile: (tb, n_obs) f32 -> cast to bf16 in-kernel (no wrapper-side cast
    # pass over x / extra HBM round trip).
    x = x_ref[...].astype(jnp.bfloat16)

    # fc1 + ReLU (bf16 MXU matmul, f32 accumulate; bias added in f32)
    h1 = jnp.dot(x, w1_ref[...], preferred_element_type=jnp.float32) + b1_ref[...]
    h1 = jnp.maximum(h1, 0.0)

    # fc2 + ReLU
    h2 = jnp.dot(h1.astype(jnp.bfloat16), w2_ref[...],
                 preferred_element_type=jnp.float32) + b2_ref[...]
    h2 = jnp.maximum(h2, 0.0)

    # fc3 (output head, no activation) on the lane-padded weights, then store
    # only the real action columns: (tb, n_actions) masked store -> ~64x fewer
    # HBM writeback bytes than the 128-lane-padded f32 store.
    out = jnp.dot(h2.astype(jnp.bfloat16), w3_ref[...],
                  preferred_element_type=jnp.float32) + b3_ref[...]
    o_ref[...] = out[:, : o_ref.shape[-1]]


# ---------------------------------------------------------------------------
# Parameter init / packing
# ---------------------------------------------------------------------------
def init_dqn_params(key, n_observations, n_actions, n_hidden=64):
    """PyTorch-style uniform(+-1/sqrt(fan_in)) init.

    Weights are stored as (in_features, out_features) — i.e. W.T relative to
    nn.Linear — so the kernel computes x @ W + b directly.
    """
    def linear(key, fan_in, fan_out):
        kw, kb = jax.random.split(key)
        bound = 1.0 / jnp.sqrt(jnp.float32(fan_in))
        w = jax.random.uniform(kw, (fan_in, fan_out), jnp.float32, -bound, bound)
        b = jax.random.uniform(kb, (1, fan_out), jnp.float32, -bound, bound)
        return w, b

    k1, k2, k3 = jax.random.split(key, 3)
    w1, b1 = linear(k1, n_observations, n_hidden)
    w2, b2 = linear(k2, n_hidden, n_hidden)
    w3, b3 = linear(k3, n_hidden, n_actions)
    return (w1, b1, w2, b2, w3, b3)


def pack_dqn_params(params):
    """Zero-pad hidden / action dims to 128 lanes; weights -> bf16, biases f32.

    Do this once outside the training loop; the padded columns stay exactly
    zero through ReLU, and the padded fc3 columns are never written to HBM
    (the kernel stores only the first n_actions lanes).
    """
    w1, b1, w2, b2, w3, b3 = params
    n_obs, n_hidden = w1.shape
    n_actions = w3.shape[1]
    hp = _round_up(n_hidden, _LANE)
    ap = _round_up(n_actions, _LANE)

    def pad2(a, rows, cols):
        return jnp.pad(a, ((0, rows - a.shape[0]), (0, cols - a.shape[1])))

    return dict(
        w1=pad2(w1, n_obs, hp).astype(jnp.bfloat16),
        b1=pad2(b1, 1, hp).astype(jnp.float32),
        w2=pad2(w2, hp, hp).astype(jnp.bfloat16),
        b2=pad2(b2, 1, hp).astype(jnp.float32),
        w3=pad2(w3, hp, ap).astype(jnp.bfloat16),
        b3=pad2(b3, 1, ap).astype(jnp.float32),
        n_actions=n_actions,
    )


# ---------------------------------------------------------------------------
# Forward pass
# ---------------------------------------------------------------------------
def dqn_forward(x, packed, *, block_batch=1024):
    """Fused DQN forward via one pallas_call with a 'parallel' batch grid."""
    w1, b1 = packed["w1"], packed["b1"]
    w2, b2 = packed["w2"], packed["b2"]
    w3, b3 = packed["w3"], packed["b3"]
    n_actions = packed["n_actions"]

    batch, n_obs = x.shape

    # Batch tile: always a multiple of 8 sublanes (guards odd block_batch);
    # small batches collapse to a single grid step, large batches keep >=2
    # "parallel" tiles so both v7x TensorCores get work.
    block_batch = max(8, _round_up(block_batch, 8))
    tb = min(block_batch, _round_up(batch, 8))
    padded_batch = _round_up(batch, tb)

    # Only pad when actually required (no-op HBM pass otherwise).
    xp = x if padded_batch == batch else jnp.pad(x, ((0, padded_batch - batch), (0, 0)))

    grid = (padded_batch // tb,)
    resident = lambda shape: pl.BlockSpec(shape, lambda i: (0, 0))  # VMEM-resident
    # (constant index_map -> weights DMA'd once; double-buffer dup is ~65 KiB,
    #  intentionally left as-is.)

    out_padded = pl.pallas_call(
        _dqn_kernel,
        out_shape=jax.ShapeDtypeStruct((padded_batch, n_actions), jnp.float32),
        grid=grid,
        in_specs=[
            pl.BlockSpec((tb, n_obs), lambda i: (i, 0)),   # x: tiled over batch
            resident(w1.shape), resident(b1.shape),
            resident(w2.shape), resident(b2.shape),
            resident(w3.shape), resident(b3.shape),
        ],
        # Narrow (tb, n_actions) output block: last dim equals the full array
        # dim, so the (8,128) rule is satisfied; masked vst, 64x fewer bytes.
        out_specs=pl.BlockSpec((tb, n_actions), lambda i: (i, 0)),
        compiler_params=pltpu.CompilerParams(
            dimension_semantics=("parallel",)),            # megacore on v7x
    )(xp, w1, b1, w2, b2, w3, b3)

    # Note: padded batch rows (if any) hold bias values, not zeros; sliced off.
    return out_padded if padded_batch == batch else out_padded[:batch]


def dqn_reference(x, params):
    """Plain-JAX reference mirroring the kernel's bf16 storage precision."""
    w1, b1, w2, b2, w3, b3 = params
    r = lambda a: a.astype(jnp.bfloat16).astype(jnp.float32)
    h1 = jnp.maximum(r(x) @ r(w1) + b1, 0.0)
    h2 = jnp.maximum(r(h1) @ r(w2) + b2, 0.0)
    return r(h2) @ r(w3) + b3


# ---------------------------------------------------------------------------
if __name__ == "__main__":
    n_observations = 4   # e.g. CartPole observation dim
    n_actions = 2
    n_hidden = 64

    key = jax.random.PRNGKey(0)
    kx1, kx2, kp = jax.random.split(key, 3)

    params = init_dqn_params(kp, n_observations, n_actions, n_hidden)
    packed = pack_dqn_params(params)

    # Small case: single grid step, no batch padding, no wrapper pad/slice.
    x_small = jax.random.normal(kx1, (8, n_observations), dtype=jnp.float32)
    out_small = jax.block_until_ready(dqn_forward(x_small, packed))
    ref_small = dqn_reference(x_small, params)
    assert out_small.shape == (8, n_actions)
    assert jnp.allclose(out_small, ref_small, atol=1e-4, rtol=1e-4), \
        "Pallas kernel mismatch vs reference (small batch)"

    # Ragged batch that exercises the batch grid + padding path (3 tiles).
    x_big = jax.random.normal(kx2, (300, n_observations), dtype=jnp.float32)
    out_big = jax.block_until_ready(dqn_forward(x_big, packed, block_batch=128))
    ref_big = dqn_reference(x_big, params)
    assert out_big.shape == (300, n_actions)
    assert jnp.allclose(out_big, ref_big, atol=1e-4, rtol=1e-4), \
        "Pallas kernel mismatch vs reference (tiled batch)"

    # Odd block_batch (previous lowering hazard): must round up to 8 sublanes.
    out_odd = jax.block_until_ready(dqn_forward(x_big, packed, block_batch=100))
    assert out_odd.shape == (300, n_actions)
    assert jnp.allclose(out_odd, ref_big, atol=1e-4, rtol=1e-4), \
        "Pallas kernel mismatch vs reference (odd block_batch)"

    print("KERNEL_OK")
</pallas_src>

<mosaic_0001>
module attributes {stable_mosaic.version = 11 : i64} {
  func.func @_dqn_kernel(%arg0: i32, %arg1: memref<8x4xf32, #tpu.memory_space<vmem>>, %arg2: memref<4x128xbf16, #tpu.memory_space<vmem>>, %arg3: memref<1x128xf32, #tpu.memory_space<vmem>>, %arg4: memref<128x128xbf16, #tpu.memory_space<vmem>>, %arg5: memref<1x128xf32, #tpu.memory_space<vmem>>, %arg6: memref<128x128xbf16, #tpu.memory_space<vmem>>, %arg7: memref<1x128xf32, #tpu.memory_space<vmem>>, %arg8: memref<8x2xf32, #tpu.memory_space<vmem>>) attributes {dimension_semantics = [#tpu.dimension_semantics<parallel>], iteration_bounds = array<i64: 1>, scalar_prefetch = 0 : i64, scratch_operands = 0 : i64, tpu.core_type = #tpu.core_type<tc>, window_params = [{transform_indices = @transform_0, window_bounds = array<i64: 8, 4>}, {pipeline_mode = #tpu.pipeline_mode<synchronous>, transform_indices = @transform_1, window_bounds = array<i64: 4, 128>}, {pipeline_mode = #tpu.pipeline_mode<synchronous>, transform_indices = @transform_2, window_bounds = array<i64: 1, 128>}, {pipeline_mode = #tpu.pipeline_mode<synchronous>, transform_indices = @transform_3, window_bounds = array<i64: 128, 128>}, {pipeline_mode = #tpu.pipeline_mode<synchronous>, transform_indices = @transform_4, window_bounds = array<i64: 1, 128>}, {pipeline_mode = #tpu.pipeline_mode<synchronous>, transform_indices = @transform_5, window_bounds = array<i64: 128, 128>}, {pipeline_mode = #tpu.pipeline_mode<synchronous>, transform_indices = @transform_6, window_bounds = array<i64: 1, 128>}, {transform_indices = @transform_7, window_bounds = array<i64: 8, 2>}]} {
    %c0 = arith.constant 0 : index
    %c0_0 = arith.constant 0 : index
    %0 = vector.load %arg1[%c0, %c0_0] : memref<8x4xf32, #tpu.memory_space<vmem>>, vector<8x4xf32>
    %1 = arith.truncf %0 : vector<8x4xf32> to vector<8x4xbf16>
    %c0_1 = arith.constant 0 : index
    %c0_2 = arith.constant 0 : index
    %2 = vector.load %arg2[%c0_1, %c0_2] : memref<4x128xbf16, #tpu.memory_space<vmem>>, vector<4x128xbf16>
    %cst = arith.constant dense<0.000000e+00> : vector<8x128xf32>
    %3 = tpu.matmul %1, %2, %cst {dimension_numbers = #tpu.dot_dimension_numbers<[1], [0], [0], [1], [0, 0, 1, 1], [], []>} : vector<8x4xbf16>, vector<4x128xbf16>, vector<8x128xf32> -> vector<8x128xf32>
    %c0_3 = arith.constant 0 : index
    %c0_4 = arith.constant 0 : index
    %4 = vector.load %arg3[%c0_3, %c0_4] : memref<1x128xf32, #tpu.memory_space<vmem>>, vector<1x128xf32>
    %5 = vector.broadcast %4 : vector<1x128xf32> to vector<8x128xf32>
    %6 = arith.addf %3, %5 : vector<8x128xf32>
    %cst_5 = arith.constant 0.000000e+00 : f32
    %7 = vector.broadcast %cst_5 : f32 to vector<8x128xf32>
    %8 = arith.maximumf %6, %7 : vector<8x128xf32>
    %9 = arith.truncf %8 : vector<8x128xf32> to vector<8x128xbf16>
    %c0_6 = arith.constant 0 : index
    %c0_7 = arith.constant 0 : index
    %10 = vector.load %arg4[%c0_6, %c0_7] : memref<128x128xbf16, #tpu.memory_space<vmem>>, vector<128x128xbf16>
    %cst_8 = arith.constant dense<0.000000e+00> : vector<8x128xf32>
    %11 = tpu.matmul %9, %10, %cst_8 {dimension_numbers = #tpu.dot_dimension_numbers<[1], [0], [0], [1], [0, 0, 1, 1], [], []>} : vector<8x128xbf16>, vector<128x128xbf16>, vector<8x128xf32> -> vector<8x128xf32>
    %c0_9 = arith.constant 0 : index
    %c0_10 = arith.constant 0 : index
    %12 = vector.load %arg5[%c0_9, %c0_10] : memref<1x128xf32, #tpu.memory_space<vmem>>, vector<1x128xf32>
    %13 = vector.broadcast %12 : vector<1x128xf32> to vector<8x128xf32>
    %14 = arith.addf %11, %13 : vector<8x128xf32>
    %cst_11 = arith.constant 0.000000e+00 : f32
    %15 = vector.broadcast %cst_11 : f32 to vector<8x128xf32>
    %16 = arith.maximumf %14, %15 : vector<8x128xf32>
    %17 = arith.truncf %16 : vector<8x128xf32> to vector<8x128xbf16>
    %c0_12 = arith.constant 0 : index
    %c0_13 = arith.constant 0 : index
    %18 = vector.load %arg6[%c0_12, %c0_13] : memref<128x128xbf16, #tpu.memory_space<vmem>>, vector<128x128xbf16>
    %cst_14 = arith.constant dense<0.000000e+00> : vector<8x128xf32>
    %19 = tpu.matmul %17, %18, %cst_14 {dimension_numbers = #tpu.dot_dimension_numbers<[1], [0], [0], [1], [0, 0, 1, 1], [], []>} : vector<8x128xbf16>, vector<128x128xbf16>, vector<8x128xf32> -> vector<8x128xf32>
    %c0_15 = arith.constant 0 : index
    %c0_16 = arith.constant 0 : index
    %20 = vector.load %arg7[%c0_15, %c0_16] : memref<1x128xf32, #tpu.memory_space<vmem>>, vector<1x128xf32>
    %21 = vector.broadcast %20 : vector<1x128xf32> to vector<8x128xf32>
    %22 = arith.addf %19, %21 : vector<8x128xf32>
    %23 = vector.extract_strided_slice %22 {offsets = [0, 0], sizes = [8, 2], strides = [1, 1]} : vector<8x128xf32> to vector<8x2xf32>
    %c0_17 = arith.constant 0 : index
    %c0_18 = arith.constant 0 : index
    %24 = vector.load %arg8[%c0_17, %c0_18] : memref<8x2xf32, #tpu.memory_space<vmem>>, vector<8x2xf32>
    tpu.vector_store %arg8[%c0_17, %c0_18], %23 {strides = array<i32>} : memref<8x2xf32, #tpu.memory_space<vmem>>, vector<8x2xf32>,
    return
  }
  func.func @transform_0(%arg0: i32) -> (i32, i32) {
    %c0_i32 = arith.constant 0 : i32
    %c0_i32_0 = arith.constant 0 : i32
    return %arg0, %c0_i32 : i32, i32
  }
  func.func @transform_1(%arg0: i32) -> (i32, i32) {
    %c0_i32 = arith.constant 0 : i32
    %c0_i32_0 = arith.constant 0 : i32
    %c0_i32_1 = arith.constant 0 : i32
    return %c0_i32, %c0_i32_0 : i32, i32
  }
  func.func @transform_2(%arg0: i32) -> (i32, i32) {
    %c0_i32 = arith.constant 0 : i32
    %c0_i32_0 = arith.constant 0 : i32
    %c0_i32_1 = arith.constant 0 : i32
    return %c0_i32, %c0_i32_0 : i32, i32
  }
  func.func @transform_3(%arg0: i32) -> (i32, i32) {
    %c0_i32 = arith.constant 0 : i32
    %c0_i32_0 = arith.constant 0 : i32
    %c0_i32_1 = arith.constant 0 : i32
    return %c0_i32, %c0_i32_0 : i32, i32
  }
  func.func @transform_4(%arg0: i32) -> (i32, i32) {
    %c0_i32 = arith.constant 0 : i32
    %c0_i32_0 = arith.constant 0 : i32
    %c0_i32_1 = arith.constant 0 : i32
    return %c0_i32, %c0_i32_0 : i32, i32
  }
  func.func @transform_5(%arg0: i32) -> (i32, i32) {
    %c0_i32 = arith.constant 0 : i32
    %c0_i32_0 = arith.constant 0 : i32
    %c0_i32_1 = arith.constant 0 : i32
    return %c0_i32, %c0_i32_0 : i32, i32
  }
  func.func @transform_6(%arg0: i32) -> (i32, i32) {
    %c0_i32 = arith.constant 0 : i32
    %c0_i32_0 = arith.constant 0 : i32
    %c0_i32_1 = arith.constant 0 : i32
    return %c0_i32, %c0_i32_0 : i32, i32
  }
  func.func @transform_7(%arg0: i32) -> (i32, i32) {
    %c0_i32 = arith.constant 0 : i32
    %c0_i32_0 = arith.constant 0 : i32
    return %arg0, %c0_i32 : i32, i32
  }
}

</mosaic_0001>

<bundles_post_ra>
// kernel: tpu_custom_call.1
= control target key start
LH: loop header
LB: loop body
LE: loop exit
PB: predicated region body
PF: predicated region fallthrough
CT: control target
= control target key end

     0   :  { %12 = vsyncpa [#allocation3], 0  ;;  %s592_s0 = inlined_call_operand.vmem [shape: f32[8,4], index: 0, kind: input, shape index: {}]   ;;  %s593_s1 = inlined_call_operand.vmem [shape: bf16[4,128], index: 1, kind: input, shape index: {}]   ;;  %s594_s2 = inlined_call_operand.vmem [shape: f32[1,128], index: 2, kind: input, shape index: {}]   ;;  %s595_s3 = inlined_call_operand.hbm [shape: bf16[128,128], index: 3, kind: input, shape index: {}]   ;;  %s596_s4 = inlined_call_operand.vmem [shape: f32[1,128], index: 4, kind: input, shape index: {}]   ;;  %s597_s5 = inlined_call_operand.hbm [shape: bf16[128,128], index: 5, kind: input, shape index: {}]   ;;  %s598_s6 = inlined_call_operand.vmem [shape: f32[1,128], index: 6, kind: input, shape index: {}]   ;;  %s599_s7 = inlined_call_operand.vmem [shape: f32[8,2], index: 7, kind: output, shape index: {}]  }
   0x1   :  { %13 = vsyncpa [#allocation5], 0  ;;  %s499_s24 = smov [#allocation2]  }
   0x2   :  { %s25_s25 = sshll.u32 %s499_s24, 4  ;;  %s26_s25 = int_to_ptr.vmem [resolvable:$true] %s25_s25 }
   0x3   :  { %s463_s26 = scalar_lea.vmem %s26_s25, 1024  ;;  %p468_p1 = scmp.lt.s32.totalorder %s26_s25, %s26_s25 }
   0x4   :  { %p464_p0 = scmp.ne.s32.totalorder %s26_s25, %s463_s26  ;;  %p469_p2 = scmp.lt.s32.totalorder %s463_s26, %s463_s26 }
   0x6   :  { %p470_p3 = por %p469_p2, %p468_p1 }
   0x8   :  { %p471_p4 = pnand %p470_p3, %p464_p0 }
   0xa   :  { %474 = shalt.err (!%p471_p4)
}
   0xb   :  { %s500_s27 = smov 64   ;;  %s501_s28 = smov 4  }
   0xc   :  { %31 = dma.hbm_to_vmem [thread:$0]  %s595_s3, 1024, %s26_s25, [#allocation3], %s500_s27, %s500_s27, %s501_s28  }
   0xd   :  { %s502_s8 = smov [#allocation4]  }
   0xe   :  { %s39_s9 = sshll.u32 %s502_s8, 4  ;;  %s40_s9 = int_to_ptr.vmem [resolvable:$true] %s39_s9 }
   0xf   :  { %s483_s10 = scalar_lea.vmem %s40_s9, 1024  ;;  %p488_p6 = scmp.lt.s32.totalorder %s40_s9, %s40_s9 }
  0x10   :  { %p484_p5 = scmp.ne.s32.totalorder %s40_s9, %s483_s10  ;;  %p489_p7 = scmp.lt.s32.totalorder %s483_s10, %s483_s10 }
  0x12   :  { %p490_p8 = por %p489_p7, %p488_p6 }
  0x14   :  { %p491_p9 = pnand %p490_p8, %p484_p5 }
  0x16   :  { %494 = shalt.err (!%p491_p9)
}
  0x17   :  { %45 = dma.hbm_to_vmem [thread:$0]  %s597_s5, 1024, %s40_s9, [#allocation5], %s500_s27, %s500_s27, %s501_s28  }
  0x18   :  { %495 = dma.done.wait [#allocation3], 1024  }
  0x19   :  { %496 = vsyncadd [#allocation3], 4294966272 }
  0x1a   :  { %497 = dma.done.wait [#allocation5], 1024  }
  0x1b   :  { %498 = vsyncadd [#allocation5], 4294966272  ;;  %v503_v0 = vmov 0.0   ;;  %vm504_vm0 = vmmov 0   ;;  %vm69_vm1 = vcmask 1041408   ;;  %v55_v2 = vld [vmem:[%s592_s0] sm:$0xff] }
  0x1c   :  { %387 = vmatprep.subr.bf16.mxu0 %v503_v0  ;;  %389 = vmatprep.mubr.msk.bf16.mxu0 %vm504_vm0, %v503_v0  ;;  %v57_v1 = vld [vmem:[%s593_s1] sm:$0x3]  ;;  %v56_v4 = vpack.c.bf16 %v55_v2, %v55_v2  ;;  %v439_v5 = vld [vmem:[#allocation2 + $0x38] sm:$0xff]   ;;  %vm65_vm2 = vcmask 31744   ;;  %v440_v6 = vld [vmem:[#allocation2 + $0x30] sm:$0xff]   ;;  %vm339_vm3 = vcmask 15360  }
  0x1d   :  { %393 = vmatprep.subr.bf16.mxu1 %v503_v0  ;;  %409 = vmatprep.mubr.msk.bf16.mxu1 %vm504_vm0, %v503_v0  ;;  %v71_v3 = vsel %vm69_vm1, %v57_v1, 0  ;;  %v441_v7 = vld [vmem:[#allocation2 + $0x28] sm:$0xff]   ;;  %v442_v8 = vld [vmem:[#allocation2 + $0x20] sm:$0xff]   ;;  %v443_v9 = vld [vmem:[#allocation2 + $0x18] sm:$0xff]  }
  0x1e   :  { %388 = vmatpush3.bf16.msra.mxu0 %v71_v3  ;;  %394 = vmatpush3.bf16.msra.mxu1 %v439_v5  ;;  %v444_v10 = vld [vmem:[#allocation2 + $0x10] sm:$0xff]   ;;  %v445_v11 = vld [vmem:[#allocation2 + $0x8] sm:$0xff]   ;;  %v446_v12 = vld [vmem:[#allocation2] sm:$0xff]  }
  0x1f   :  { %413 = vmatprep.subr.bf16.mxu0 %v503_v0  ;;  %395 = vmatprep.subr.bf16.mxu1 %v503_v0  ;;  %v447_v13 = vld [vmem:[#allocation4 + $0x38] sm:$0xff]   ;;  %v448_v14 = vld [vmem:[#allocation4 + $0x30] sm:$0xff]   ;;  %v449_v15 = vld [vmem:[#allocation4 + $0x28] sm:$0xff]  }
  0x20   :  { %v450_v16 = vld [vmem:[#allocation4 + $0x20] sm:$0xff]   ;;  %v451_v17 = vld [vmem:[#allocation4 + $0x18] sm:$0xff]   ;;  %v452_v18 = vld [vmem:[#allocation4 + $0x10] sm:$0xff]  }
  0x21   :  { %390 = vmatmul.mubr.msk.bf16.vlgmr.msra.gmra.mxu0 %vm65_vm2, %v56_v4  ;;  %v347_v19 = vld [vmem:[%s594_s2] ss:$0 sm:$0xff]  ;;  %v453_v27 = vld [vmem:[#allocation4 + $0x8] sm:$0xff]  }
  0x22   :  { %429 = vmatprep.mubr.msk.bf16.mxu0 %vm504_vm0, %v503_v0  ;;  %396 = vmatpush3.bf16.msra.mxu1 %v440_v6  ;;  %v454_v28 = vld [vmem:[#allocation4] sm:$0xff]  }
  0x23   :  { %397 = vmatprep.subr.bf16.mxu1 %v503_v0  ;;  %414 = vmatpush3.bf16.msra.mxu0 %v447_v13  ;;  %v349_v29 = vld [vmem:[%s596_s4] ss:$0 sm:$0xff] }
  0x24   :  { %415 = vmatprep.subr.bf16.mxu0 %v503_v0  ;;  %v358_v37 = vld [vmem:[%s598_s6] ss:$0 sm:$0xff] }
  0x26   :  { %398 = vmatpush3.bf16.msra.mxu1 %v441_v7 }
  0x27   :  { %399 = vmatprep.subr.bf16.mxu1 %v503_v0  ;;  %416 = vmatpush3.bf16.msra.mxu0 %v448_v14 }
  0x28   :  { %417 = vmatprep.subr.bf16.mxu0 %v503_v0 }
  0x2a   :  { %400 = vmatpush3.bf16.msra.mxu1 %v442_v8 }
  0x2b   :  { %401 = vmatprep.subr.bf16.mxu1 %v503_v0  ;;  %418 = vmatpush3.bf16.msra.mxu0 %v449_v15 }
  0x2c   :  { %419 = vmatprep.subr.bf16.mxu0 %v503_v0 }
  0x2e   :  { %402 = vmatpush3.bf16.msra.mxu1 %v443_v9 }
  0x2f   :  { %403 = vmatprep.subr.bf16.mxu1 %v503_v0  ;;  %420 = vmatpush3.bf16.msra.mxu0 %v450_v16 }
  0x30   :  { %421 = vmatprep.subr.bf16.mxu0 %v503_v0 }
  0x32   :  { %404 = vmatpush3.bf16.msra.mxu1 %v444_v10 }
  0x33   :  { %405 = vmatprep.subr.bf16.mxu1 %v503_v0  ;;  %422 = vmatpush3.bf16.msra.mxu0 %v451_v17 }
  0x34   :  { %423 = vmatprep.subr.bf16.mxu0 %v503_v0 }
  0x36   :  { %406 = vmatpush3.bf16.msra.mxu1 %v445_v11 }
  0x37   :  { %407 = vmatprep.subr.bf16.mxu1 %v503_v0  ;;  %424 = vmatpush3.bf16.msra.mxu0 %v452_v18 }
  0x38   :  { %425 = vmatprep.subr.bf16.mxu0 %v503_v0 }
  0x3a   :  { %408 = vmatpush3.bf16.msra.mxu1 %v446_v12 }
  0x3b   :  { %426 = vmatpush3.bf16.msra.mxu0 %v453_v27 }
  0x3c   :  { %427 = vmatprep.subr.bf16.mxu0 %v503_v0 }
  0x3f   :  { %428 = vmatpush3.bf16.msra.mxu0 %v454_v28 }
  0xe1   :  { %v107_v20 = vpop.f32.mrf.mxu0 }
  0xe2   :  { %v108_v21 = vadd.f32 %v347_v19, %v107_v20 }
  0xe3   :  { %v391_v22 = vpop.f32.mrf.mxu0 }
  0xe4   :  { %v113_v23 = vmax.f32 %v108_v21, 0.0 }
  0xe5   :  { %v110_v24 = vpop.f32.mrf.mxu0 }
  0xe6   :  { %v114_v25 = vpack.c.bf16 %v113_v23, %v113_v23 }
  0xe7   :  { %v392_v26 = vpop.f32.mrf.mxu0 }
  0xe8   :  { %410 = vmatmul.mubr.bf16.vlgmr.msra.gmra.mxu1 %v114_v25 }
 0x1a8   :  { %v220_v30 = vpop.f32.mrf.mxu1 }
 0x1a9   :  { %v221_v31 = vadd.f32 %v349_v29, %v220_v30 }
 0x1aa   :  { %v411_v32 = vpop.f32.mrf.mxu1 }
 0x1ab   :  { %v226_v33 = vmax.f32 %v221_v31, 0.0 }
 0x1ac   :  { %v223_v34 = vpop.f32.mrf.mxu1 }
 0x1ad   :  { %v227_v35 = vpack.c.bf16 %v226_v33, %v226_v33 }
 0x1ae   :  { %v412_v36 = vpop.f32.mrf.mxu1 }
 0x1af   :  { %430 = vmatmul.mubr.bf16.vlgmr.msra.gmra.mxu0 %v227_v35 }
 0x26f   :  { %v333_v38 = vpop.f32.mrf.mxu0 }
 0x270   :  { %v334_v39 = vadd.f32 %v358_v37, %v333_v38 }
 0x271   :  { %v431_v40 = vpop.f32.mrf.mxu0 }
 0x272   :  { %340 = vst.msk [vmem:[%s599_s7] sm:$0xff] %vm339_vm3, %v334_v39 }
 0x273   :  { %v336_v41 = vpop.f32.mrf.mxu0 }
 0x275   :  { %v432_v42 = vpop.f32.mrf.mxu0 }
 0x276   :  { %345 = vsyncpa [#allocation3], 1 }
 0x277   :  { %346 = vsyncpa [#allocation5], 1 }

</bundles_post_ra>
